<compile_context>
chip_gen: v7x
topology: tpu7x:2x2x1
jax: 0.10.0
libtpu: 0.0.40
codegen_flags: <defaults>
</compile_context>

<pallas_src>
import jax
import jax.numpy as jnp
from jax import lax
from jax.experimental import pallas as pl
from jax.experimental.pallas import tpu as pltpu


def _round_up(v, m):
    return (v + m - 1) // m * m


def _vmem_limit_bytes():
    """Per-chip VMEM budget with ~8 MiB headroom (v5e/v6e: 128 MiB, v7x: 64 MiB)."""
    try:
        cap = int(pltpu.get_tpu_info().vmem_capacity_bytes)
    except Exception:
        cap = 64 * 1024 * 1024  # conservative (v7x physical)
    return max(cap - 8 * 1024 * 1024, 32 * 1024 * 1024)


# ----------------------------------------------------------------------------
# Kernels
# ----------------------------------------------------------------------------

def _mlp_resident_kernel(x_ref, w_ref, o_ref):
    """Whole network for one batch tile; all L weights resident in VMEM.

    x_ref : (TB, Np)     bf16  input activations for this batch tile
    w_ref : (L, Np, Np)  bf16  all weights, already in (in, out) layout
    o_ref : (TB, Np)     bf16  final activations for this batch tile
    """
    n_layers = w_ref.shape[0]

    def layer(l, h):
        y = jnp.dot(h, w_ref[l], preferred_element_type=jnp.float32)  # MXU, f32 acc
        return jnp.maximum(y, 0.0).astype(jnp.bfloat16)               # ReLU in f32

    o_ref[...] = lax.fori_loop(0, n_layers, layer, x_ref[...], unroll=True)

    # TODO(synk): the per-layer `print('layers:{}, std:{}')` and the NaN
    # early-break of the PyTorch forward are host-side logging with
    # data-dependent control flow; they do not affect the returned tensor and
    # are not representable inside a TPU kernel.


def _mlp_stream_kernel(x_ref, w_ref, o_ref):
    """One grid step == one Linear(bias=False) + ReLU layer on one batch tile.

    x_ref : (TB, Np) bf16   input activations (read only at layer 0)
    w_ref : (Np, Np) bf16   this layer's weight, (in, out) layout
    o_ref : (TB, Np) bf16   output block; doubles as the VMEM-resident
                            activation carried across the layer grid axis
    """
    layer = pl.program_id(1)

    @pl.when(layer == 0)
    def _():
        h = jnp.dot(x_ref[...], w_ref[...], preferred_element_type=jnp.float32)
        o_ref[...] = jnp.maximum(h, 0.0).astype(o_ref.dtype)

    @pl.when(layer > 0)
    def _():
        h = jnp.dot(o_ref[...], w_ref[...], preferred_element_type=jnp.float32)
        o_ref[...] = jnp.maximum(h, 0.0).astype(o_ref.dtype)

    # TODO(synk): for production Np on v7x (64 MiB VMEM), column-tile the
    # weight along the output-feature dim with a ping-pong activation pair
    # instead of holding full (Np, Np) layer tiles.


# ----------------------------------------------------------------------------
# Wrappers
# ----------------------------------------------------------------------------

def prepare_weights(weights, n_p):
    """One-time transform: (L, out, in) f32 torch layout -> (L, in, out) bf16,
    zero-padded to (L, n_p, n_p).  Keep the result across forward calls so the
    transpose/pad/cast HBM traffic is not paid per call."""
    L, n_out, n_in = weights.shape
    w_t = jnp.transpose(weights, (0, 2, 1)).astype(jnp.bfloat16)
    return jnp.zeros((L, n_p, n_p), jnp.bfloat16).at[:, :n_in, :n_out].set(w_t)


def mlp_forward(x, w_packed, *, n_features, batch_tile=512, mode="auto"):
    """x: (B, N) f32;  w_packed: (L, n_p, n_p) bf16 from prepare_weights()."""
    B, N = x.shape
    assert N == n_features
    L, n_p, n_p2 = w_packed.shape
    assert n_p == n_p2 and n_p % 128 == 0 and n_p >= N and L >= 1
    assert w_packed.dtype == jnp.bfloat16

    # Batch tiling: aim for MXU-bound tiles (multiple of 256 rows on v6e/v7x
    # when the batch allows it), multiple of 8 otherwise.
    if B >= 256:
        tb = min(_round_up(B, 256), max(_round_up(batch_tile, 256), 256))
    else:
        tb = min(_round_up(B, 8), _round_up(batch_tile, 8))
    b_p = _round_up(B, tb)
    # v7x megacore: give the "parallel" batch axis >= 2 tiles when possible so
    # the second TensorCore is fed.  Cheap: the weight block index is constant
    # (resident path), so splitting adds no weight DMA.
    if b_p // tb == 1 and b_p >= 16:
        b_p = _round_up(B, 16)
        tb = b_p // 2

    x_p = jnp.zeros((b_p, n_p), jnp.bfloat16).at[:B, :N].set(x.astype(jnp.bfloat16))

    vmem_limit = _vmem_limit_bytes()
    w_bytes = L * n_p * n_p * 2
    act_bytes = 2 * (2 * tb * n_p * 2)  # double-buffered x + o, bf16
    resident_fits = 2 * w_bytes + act_bytes <= int(0.85 * vmem_limit)

    if mode == "resident":
        use_resident = True
    elif mode == "stream":
        use_resident = False
    else:
        use_resident = resident_fits

    if use_resident:
        out = pl.pallas_call(
            _mlp_resident_kernel,
            out_shape=jax.ShapeDtypeStruct((b_p, n_p), jnp.bfloat16),
            grid_spec=pltpu.PrefetchScalarGridSpec(
                num_scalar_prefetch=0,
                grid=(b_p // tb,),
                in_specs=[
                    pl.BlockSpec((tb, n_p), lambda b: (b, 0)),
                    # Constant block index -> the whole weight stack is DMA'd
                    # once per core and stays VMEM-resident for all batch tiles.
                    pl.BlockSpec((L, n_p, n_p), lambda b: (0, 0, 0)),
                ],
                out_specs=pl.BlockSpec((tb, n_p), lambda b: (b, 0)),
            ),
            compiler_params=pltpu.CompilerParams(
                dimension_semantics=("parallel",),
                vmem_limit_bytes=vmem_limit,
            ),
        )(x_p, w_packed)
    else:
        # Per-layer weight streaming; output block is the resident activation
        # accumulator across the sequential layer axis.
        out = pl.pallas_call(
            _mlp_stream_kernel,
            out_shape=jax.ShapeDtypeStruct((b_p, n_p), jnp.bfloat16),
            grid_spec=pltpu.PrefetchScalarGridSpec(
                num_scalar_prefetch=0,
                grid=(b_p // tb, L),  # sequential (layer) axis last
                in_specs=[
                    pl.BlockSpec((tb, n_p), lambda b, l: (b, 0)),
                    pl.BlockSpec((pl.Squeezed(), n_p, n_p), lambda b, l: (l, 0, 0)),
                ],
                out_specs=pl.BlockSpec((tb, n_p), lambda b, l: (b, 0)),
            ),
            compiler_params=pltpu.CompilerParams(
                dimension_semantics=("parallel", "arbitrary"),
                vmem_limit_bytes=vmem_limit,
            ),
        )(x_p, w_packed)

    return out[:B, :N].astype(jnp.float32)


# ----------------------------------------------------------------------------
# References
# ----------------------------------------------------------------------------

def mlp_reference_f32(x, weights):
    """Pure-JAX f32 reference of the PyTorch forward."""
    h = x
    for i in range(weights.shape[0]):
        h = jnp.maximum(h @ weights[i].T, 0.0)
    return h


def mlp_reference_bf16(x, weights):
    """Precision-matched reference: bf16 operands / activations, f32 accumulation."""
    h = x.astype(jnp.bfloat16)
    for i in range(weights.shape[0]):
        w = weights[i].T.astype(jnp.bfloat16)
        y = jnp.dot(h, w, preferred_element_type=jnp.float32)
        h = jnp.maximum(y, 0.0).astype(jnp.bfloat16)
    return h.astype(jnp.float32)


if __name__ == "__main__":
    # Small shapes consistent with the module: MLP(neural_num, layers)
    neural_num = 32
    layers = 6
    batch = 16

    key = jax.random.PRNGKey(0)
    kx, kw = jax.random.split(key)

    x = jax.random.normal(kx, (batch, neural_num), dtype=jnp.float32)

    # initialize(): kaiming_normal_ on each Linear weight
    #   std = gain / sqrt(fan_in) = sqrt(2 / neural_num)
    kaiming_std = jnp.sqrt(2.0 / neural_num)
    weights = (
        jax.random.normal(kw, (layers, neural_num, neural_num), dtype=jnp.float32)
        * kaiming_std
    )

    # One-time weight packing (transpose + pad + bf16), reused across calls.
    n_p = _round_up(neural_num, 128)
    w_packed = jax.block_until_ready(prepare_weights(weights, n_p))

    # Preferred (resident) path.
    out = jax.block_until_ready(mlp_forward(x, w_packed, n_features=neural_num))
    assert out.shape == (batch, neural_num)

    ref_matched = mlp_reference_bf16(x, weights)
    ref_f32 = mlp_reference_f32(x, weights)
    assert jnp.allclose(out, ref_matched, rtol=2e-2, atol=2e-2), \
        "resident path: mismatch vs precision-matched (bf16) reference"
    assert jnp.allclose(out, ref_f32, rtol=1e-1, atol=1e-1), \
        "resident path: mismatch vs f32 reference"

    # Also exercise the per-layer streaming fallback path.
    out_stream = jax.block_until_ready(
        mlp_forward(x, w_packed, n_features=neural_num, mode="stream"))
    assert jnp.allclose(out_stream, ref_matched, rtol=2e-2, atol=2e-2), \
        "stream path: mismatch vs precision-matched (bf16) reference"

    print("KERNEL_OK")
</pallas_src>

<mosaic_0001>
module attributes {stable_mosaic.version = 11 : i64} {
  func.func @_mlp_resident_kernel(%arg0: i32, %arg1: memref<8x128xbf16, #tpu.memory_space<vmem>>, %arg2: memref<6x128x128xbf16, #tpu.memory_space<vmem>>, %arg3: memref<8x128xbf16, #tpu.memory_space<vmem>>) attributes {dimension_semantics = [#tpu.dimension_semantics<parallel>], iteration_bounds = array<i64: 2>, scalar_prefetch = 0 : i64, scratch_operands = 0 : i64, tpu.core_type = #tpu.core_type<tc>, window_params = [{transform_indices = @transform_0, window_bounds = array<i64: 8, 128>}, {pipeline_mode = #tpu.pipeline_mode<synchronous>, transform_indices = @transform_1, window_bounds = array<i64: 6, 128, 128>}, {transform_indices = @transform_2, window_bounds = array<i64: 8, 128>}]} {
    %c0 = arith.constant 0 : index
    %c0_0 = arith.constant 0 : index
    %0 = vector.load %arg1[%c0, %c0_0] : memref<8x128xbf16, #tpu.memory_space<vmem>>, vector<8x128xbf16>
    %c0_i32 = arith.constant 0 : i32
    %1 = arith.index_cast %c0_i32 : i32 to index
    %c0_1 = arith.constant 0 : index
    %c0_2 = arith.constant 0 : index
    %2 = vector.load %arg2[%1, %c0_1, %c0_2] : memref<6x128x128xbf16, #tpu.memory_space<vmem>>, vector<1x128x128xbf16>
    %3 = vector.shape_cast %2 : vector<1x128x128xbf16> to vector<128x128xbf16>
    %cst = arith.constant dense<0.000000e+00> : vector<8x128xf32>
    %4 = tpu.matmul %0, %3, %cst {dimension_numbers = #tpu.dot_dimension_numbers<[1], [0], [0], [1], [0, 0, 1, 1], [], []>} : vector<8x128xbf16>, vector<128x128xbf16>, vector<8x128xf32> -> vector<8x128xf32>
    %cst_3 = arith.constant 0.000000e+00 : f32
    %5 = vector.broadcast %cst_3 : f32 to vector<8x128xf32>
    %6 = arith.maximumf %4, %5 : vector<8x128xf32>
    %7 = arith.truncf %6 : vector<8x128xf32> to vector<8x128xbf16>
    %c1_i32 = arith.constant 1 : i32
    %8 = arith.index_cast %c1_i32 : i32 to index
    %c0_4 = arith.constant 0 : index
    %c0_5 = arith.constant 0 : index
    %9 = vector.load %arg2[%8, %c0_4, %c0_5] : memref<6x128x128xbf16, #tpu.memory_space<vmem>>, vector<1x128x128xbf16>
    %10 = vector.shape_cast %9 : vector<1x128x128xbf16> to vector<128x128xbf16>
    %cst_6 = arith.constant dense<0.000000e+00> : vector<8x128xf32>
    %11 = tpu.matmul %7, %10, %cst_6 {dimension_numbers = #tpu.dot_dimension_numbers<[1], [0], [0], [1], [0, 0, 1, 1], [], []>} : vector<8x128xbf16>, vector<128x128xbf16>, vector<8x128xf32> -> vector<8x128xf32>
    %cst_7 = arith.constant 0.000000e+00 : f32
    %12 = vector.broadcast %cst_7 : f32 to vector<8x128xf32>
    %13 = arith.maximumf %11, %12 : vector<8x128xf32>
    %14 = arith.truncf %13 : vector<8x128xf32> to vector<8x128xbf16>
    %c2_i32 = arith.constant 2 : i32
    %15 = arith.index_cast %c2_i32 : i32 to index
    %c0_8 = arith.constant 0 : index
    %c0_9 = arith.constant 0 : index
    %16 = vector.load %arg2[%15, %c0_8, %c0_9] : memref<6x128x128xbf16, #tpu.memory_space<vmem>>, vector<1x128x128xbf16>
    %17 = vector.shape_cast %16 : vector<1x128x128xbf16> to vector<128x128xbf16>
    %cst_10 = arith.constant dense<0.000000e+00> : vector<8x128xf32>
    %18 = tpu.matmul %14, %17, %cst_10 {dimension_numbers = #tpu.dot_dimension_numbers<[1], [0], [0], [1], [0, 0, 1, 1], [], []>} : vector<8x128xbf16>, vector<128x128xbf16>, vector<8x128xf32> -> vector<8x128xf32>
    %cst_11 = arith.constant 0.000000e+00 : f32
    %19 = vector.broadcast %cst_11 : f32 to vector<8x128xf32>
    %20 = arith.maximumf %18, %19 : vector<8x128xf32>
    %21 = arith.truncf %20 : vector<8x128xf32> to vector<8x128xbf16>
    %c3_i32 = arith.constant 3 : i32
    %22 = arith.index_cast %c3_i32 : i32 to index
    %c0_12 = arith.constant 0 : index
    %c0_13 = arith.constant 0 : index
    %23 = vector.load %arg2[%22, %c0_12, %c0_13] : memref<6x128x128xbf16, #tpu.memory_space<vmem>>, vector<1x128x128xbf16>
    %24 = vector.shape_cast %23 : vector<1x128x128xbf16> to vector<128x128xbf16>
    %cst_14 = arith.constant dense<0.000000e+00> : vector<8x128xf32>
    %25 = tpu.matmul %21, %24, %cst_14 {dimension_numbers = #tpu.dot_dimension_numbers<[1], [0], [0], [1], [0, 0, 1, 1], [], []>} : vector<8x128xbf16>, vector<128x128xbf16>, vector<8x128xf32> -> vector<8x128xf32>
    %cst_15 = arith.constant 0.000000e+00 : f32
    %26 = vector.broadcast %cst_15 : f32 to vector<8x128xf32>
    %27 = arith.maximumf %25, %26 : vector<8x128xf32>
    %28 = arith.truncf %27 : vector<8x128xf32> to vector<8x128xbf16>
    %c4_i32 = arith.constant 4 : i32
    %29 = arith.index_cast %c4_i32 : i32 to index
    %c0_16 = arith.constant 0 : index
    %c0_17 = arith.constant 0 : index
    %30 = vector.load %arg2[%29, %c0_16, %c0_17] : memref<6x128x128xbf16, #tpu.memory_space<vmem>>, vector<1x128x128xbf16>
    %31 = vector.shape_cast %30 : vector<1x128x128xbf16> to vector<128x128xbf16>
    %cst_18 = arith.constant dense<0.000000e+00> : vector<8x128xf32>
    %32 = tpu.matmul %28, %31, %cst_18 {dimension_numbers = #tpu.dot_dimension_numbers<[1], [0], [0], [1], [0, 0, 1, 1], [], []>} : vector<8x128xbf16>, vector<128x128xbf16>, vector<8x128xf32> -> vector<8x128xf32>
    %cst_19 = arith.constant 0.000000e+00 : f32
    %33 = vector.broadcast %cst_19 : f32 to vector<8x128xf32>
    %34 = arith.maximumf %32, %33 : vector<8x128xf32>
    %35 = arith.truncf %34 : vector<8x128xf32> to vector<8x128xbf16>
    %c5_i32 = arith.constant 5 : i32
    %36 = arith.index_cast %c5_i32 : i32 to index
    %c0_20 = arith.constant 0 : index
    %c0_21 = arith.constant 0 : index
    %37 = vector.load %arg2[%36, %c0_20, %c0_21] : memref<6x128x128xbf16, #tpu.memory_space<vmem>>, vector<1x128x128xbf16>
    %38 = vector.shape_cast %37 : vector<1x128x128xbf16> to vector<128x128xbf16>
    %cst_22 = arith.constant dense<0.000000e+00> : vector<8x128xf32>
    %39 = tpu.matmul %35, %38, %cst_22 {dimension_numbers = #tpu.dot_dimension_numbers<[1], [0], [0], [1], [0, 0, 1, 1], [], []>} : vector<8x128xbf16>, vector<128x128xbf16>, vector<8x128xf32> -> vector<8x128xf32>
    %cst_23 = arith.constant 0.000000e+00 : f32
    %40 = vector.broadcast %cst_23 : f32 to vector<8x128xf32>
    %41 = arith.maximumf %39, %40 : vector<8x128xf32>
    %42 = arith.truncf %41 : vector<8x128xf32> to vector<8x128xbf16>
    %c6_i32 = arith.constant 6 : i32
    %c0_24 = arith.constant 0 : index
    %c0_25 = arith.constant 0 : index
    %43 = vector.load %arg3[%c0_24, %c0_25] : memref<8x128xbf16, #tpu.memory_space<vmem>>, vector<8x128xbf16>
    tpu.vector_store %arg3[%c0_24, %c0_25], %42 {strides = array<i32>} : memref<8x128xbf16, #tpu.memory_space<vmem>>, vector<8x128xbf16>,
    return
  }
  func.func @transform_0(%arg0: i32) -> (i32, i32) {
    %c0_i32 = arith.constant 0 : i32
    %c0_i32_0 = arith.constant 0 : i32
    return %arg0, %c0_i32 : i32, i32
  }
  func.func @transform_1(%arg0: i32) -> (i32, i32, i32) {
    %c0_i32 = arith.constant 0 : i32
    %c0_i32_0 = arith.constant 0 : i32
    %c0_i32_1 = arith.constant 0 : i32
    %c0_i32_2 = arith.constant 0 : i32
    return %c0_i32, %c0_i32_0, %c0_i32_1 : i32, i32, i32
  }
  func.func @transform_2(%arg0: i32) -> (i32, i32) {
    %c0_i32 = arith.constant 0 : i32
    %c0_i32_0 = arith.constant 0 : i32
    return %arg0, %c0_i32 : i32, i32
  }
}

</mosaic_0001>

<bundles_post_ra>
// kernel: tpu_custom_call.1
= control target key start
LH: loop header
LB: loop body
LE: loop exit
PB: predicated region body
PF: predicated region fallthrough
CT: control target
= control target key end

     0   :  { %7 = vsyncpa [#allocation3], 0  ;;  %s1672_s0 = inlined_call_operand.hbm [shape: bf16[16,128], index: 0, kind: input, shape index: {}]   ;;  %s1673_s1 = inlined_call_operand.hbm [shape: bf16[6,128,128], index: 1, kind: input, shape index: {}]   ;;  %s1674_s2 = inlined_call_operand.hbm [shape: bf16[16,128], index: 2, kind: output, shape index: {}]  }
   0x1   :  { %9 = vsyncpa [#allocation3 + $0x1], 0 }
   0x2   :  { %10 = vsyncpa [#allocation6], 0 }
   0x3   :  { %11 = vsyncpa [#allocation4], 0 }
   0x4   :  { %13 = vsyncpa [#allocation4 + $0x1], 0  ;;  %s1409_s9 = smov 0   ;;  %s1411_s10 = smov 0  }
   0x5   :  { %s1413_s11 = smov 0   ;;  %s1415_s12 = smov 0  }
   0x6 LB: > { %s1430_s13 = sadd.s32 4294967295, %s1385_s12   ;;  %s912_s14 = sadd.s32 4294967294, %s1385_s12   ;;  %s1385_s12 = sphi %s1415_s12, %s1694_s12   ;;  %s1381_s11 = sphi %s1413_s11, %s1693_s11   ;;  %s1377_s10 = sphi %s1411_s10, %s1692_s10   ;;  %s1373_s9 = sphi %s1409_s9, %s1691_s9  }
   0x7   : > { %p39_p0 = scmp.ne.s32.totalorder %s1377_s10, %s1373_s9  ;;  %p1675_p1 = scmp.eq.s32.totalorder %s1430_s13, 0 }
   0x8   : > { %p90_p3 = scmp.eq.s32.totalorder %s912_s14, 1  ;;  %p913_p5 = scmp.ge.s32.totalorder %s1385_s12, 1 }
   0x9   : > { %p1439_p4 = por %p1675_p1, %p39_p0  ;;  %p97_p7 = scmp.lt.s32.totalorder %s1385_s12, 3 }
   0xa   : > { %p1444_p6 = por %p90_p3, %p39_p0  ;;  %s1387_s18 = smov [#allocation5]  }
   0xb   : > { %s1678_s15 = scalar_select %p1439_p4, 1, 0 }
   0xc   : > { %s1679_s16 = scalar_select %p1444_p6, 1, 0 }
   0xd   : > { %p1449_p8 = pnand %p913_p5, %p97_p7  ;;  %s109_s19 = sshll.u32 %s1387_s18, 4  ;;  %s1453_s19 = int_to_ptr.vmem [resolvable:$true] %s109_s19 }
   0xe   : > { %s1465_s21 = sadd.s32 1, %s1385_s12   ;;  %s26_s22 = sadd.s32 1, %s1381_s11 }
   0xf   : > { %s1680_s17 = scalar_select %p1449_p8, 1, 0 }
  0x10   : > { %p1156_p9 = pneg %p1449_p8  ;;  %s23_s23 = ssub.s32 %s1385_s12, %s1465_s21 }
  0x11   : > { %s1257_s26 = scalar_lea.hbm %s1673_s1, 6144 }
  0x12   : > { %p1460_p11 = pnand %p1156_p9, %p1675_p1  ;;  %p1258_p12 = scmp.ne.s32.totalorder %s1673_s1, %s1257_s26 }
  0x13   : > { %p1264_p5 = scmp.lt.u32.totalorder %s1257_s26, %s1673_s1 }
  0x14   : > { %p1259_p13 = pneg %p1460_p11 }
  0x16   : > { %p1260_p0 = pnand %p1259_p13, %p1258_p12 }
  0x18   : > { %p1261_p3 = pneg %p1260_p0 }
  0x1a   : > { %p1266_p7 = pnand %p1264_p5, %p1261_p3 }
  0x1c   : > { %1269 = shalt.err (!%p1266_p7)
}
  0x1d   : > { %s1270_s3 = scalar_lea.vmem %s1453_s19, 6144  ;;  %p1278_p2 = scmp.lt.s32.totalorder %s1453_s19, %s1453_s19 }
  0x1e   : > { %p1271_p9 = scmp.ne.s32.totalorder %s1453_s19, %s1270_s3  ;;  %p1279_p6 = scmp.lt.s32.totalorder %s1270_s3, %s1270_s3 }
  0x20   : > { %p1273_p10 = pnand %p1271_p9, %p1259_p13  ;;  %p1280_p4 = por %p1279_p6, %p1278_p2 }
  0x22   : > { %p1274_p1 = pneg %p1273_p10 }
  0x24   : > { %p1281_p8 = pnand %p1280_p4, %p1274_p1 }
  0x26   : > { %1284 = shalt.err (!%p1281_p8)
}
  0x27   : > { %s1388_s4 = smov 64   ;;  %s1389_s5 = smov 4  }
  0x28   : > { %1159 = dma.hbm_to_vmem [thread:$0]  (!%p1460_p11), %s1673_s1, 6144, %s1453_s19, [#allocation6], %s1388_s4, %s1388_s4, %s1389_s5  }
  0x29   : > { %p24_p2 = scmp.eq.s32.totalorder %s23_s23, 0  ;;  %p33_p1 = scmp.ne.s32.totalorder %s1381_s11, %s1377_s10 }
  0x2a   : > { %p34_p4 = scmp.eq.s32.totalorder %s1385_s12, 0  ;;  %p1169_p6 = scmp.lt.s32.totalorder %s1385_s12, 2 }
  0x2b   : > { %s1496_s8 = scalar_select %p24_p2, %s1381_s11, %s26_s22  }
  0x2c   : > { %p35_p8 = por %p34_p4, %p33_p1  ;;  %p1682_p10 = scmp.eq.s32.totalorder %s1430_s13, 1 }
  0x2d   : > { %s123_s18 = sand.u32 1, %s1381_s11   ;;  %s917_s24 = sshll.u32 %s1385_s12, 6 }
  0x2e   : > { %p1500_p12 = por %p1682_p10, %p33_p1  ;;  %s916_s25 = sshll.u32 %s123_s18, 2 }
  0x2f   : > { %s1509_s27 = scalar_lea.hbm %s1672_s0, %s917_s24  ;;  %s127_s19 = scalar_lea.vmem [#allocation2], %s916_s25 }
  0x30   : > { %s134_s22 = sshll.u32 %s127_s19, 4  ;;  %p1511_p11 = pnand %p1169_p6, %p35_p8  ;;  %s1515_s22 = int_to_ptr.vmem [resolvable:$true] %s134_s22 }
  0x31   : > { %s124_s28 = scalar_lea.sflag [#allocation3], %s123_s18  ;;  %s1285_s29 = scalar_lea.hbm %s1509_s27, 64 }
  0x32   : > { %p1286_p13 = scmp.ne.s32.totalorder %s1509_s27, %s1285_s29  ;;  %p1287_p0 = pneg %p1511_p11 }
  0x33   : > { %s1290_s4 = scalar_lea.hbm %s1672_s0, 128  ;;  %p1291_p7 = scmp.lt.u32.totalorder %s1509_s27, %s1672_s0 }
  0x34   : > { %p1288_p3 = pnand %p1287_p0, %p1286_p13  ;;  %p1292_p9 = scmp.lt.u32.totalorder %s1290_s4, %s1285_s29 }
  0x35   : > { %p1294_p1 = scmp.lt.u32.totalorder %s1285_s29, %s1509_s27 }
  0x36   : > { %p1289_p5 = pneg %p1288_p3  ;;  %p1293_p2 = por %p1292_p9, %p1291_p7 }
  0x38   : > { %p1295_p4 = por %p1294_p1, %p1293_p2 }
  0x3a   : > { %p1296_p6 = pnand %p1295_p4, %p1289_p5 }
  0x3c   : > { %1299 = shalt.err (!%p1296_p6)
}
  0x3d   : > { %s1300_s7 = scalar_lea.vmem %s1515_s22, 64  ;;  %s1390_s18 = smov [#allocation2]  }
  0x3e   : > { %p1301_p8 = scmp.ne.s32.totalorder %s1515_s22, %s1300_s7  ;;  %s1305_s24 = sshll.u32 %s1390_s18, 4  ;;  %s1306_s24 = int_to_ptr.vmem [resolvable:$false] %s1305_s24 }
  0x3f   : > { %s1307_s25 = scalar_lea.vmem %s1306_s24, 128  ;;  %p1308_p3 = scmp.lt.s32.totalorder %s1515_s22, %s1306_s24 }
  0x40   : > { %p1303_p10 = pnand %p1301_p8, %p1287_p0  ;;  %p1309_p7 = scmp.lt.s32.totalorder %s1307_s25, %s1300_s7 }
  0x42   : > { %p1304_p13 = pneg %p1303_p10  ;;  %p1310_p9 = por %p1309_p7, %p1308_p3 }
  0x44   : > { %p1311_p2 = pnand %p1310_p9, %p1304_p13 }
  0x46   : > { %1314 = shalt.err (!%p1311_p2)
}
  0x47   : > { %1163 = dma.hbm_to_vmem [thread:$0]  (!%p1511_p11), %s1509_s27, 64, %s1515_s22, %s124_s28  }
  0x48   : > { %p1685_p5 = scmp.ne.s32.totalorder %s1680_s17, 0 }
  0x49   : > { %s1545_s20 = sand.u32 (!%p1685_p5), 1, %s1377_s10   ;;  %p1686_p0 = scmp.ne.s32.totalorder (!%p1685_p5), %s1678_s15, 0 }
  0x4a   : > { %143 = sbr.rel (%p1685_p5) target bundleno = 1429 (0x595), region = 28  ;;  %s919_s26 = sshll.u32 (!%p1685_p5), %s1545_s20, 2 }
  0x4b   : > { %s146_s19 = scalar_lea.sflag (!%p1685_p5), [#allocation3], %s1545_s20  ;;  %s1551_s29 = scalar_lea.vmem (!%p1685_p5), [#allocation2], %s919_s26 }
  0x51   : > { %1360 = dma.done.wait (%p1686_p0), %s146_s19, 64  }
  0x52   : > { %1362 = vsyncadd (%p1686_p0), %s146_s19, 4294967232  ;;  %p1687_p11 = scmp.eq.s32.totalorder %s1430_s13, 0 }
  0x54   : > { %1364 = dma.done.wait (%p1687_p11), [#allocation6], 6144   ;;  %p1688_p1 = pmov %p1687_p11 }
  0x55   : > { %v1391_v0 = vmov 0.0   ;;  %vm1392_vm0 = vmmov 0   ;;  %v1209_v1 = vld [vmem:[#allocation5] sm:$0xff]   ;;  %v1210_v2 = vld [vmem:[#allocation5 + $0x8] sm:$0xff]   ;;  %v1211_v3 = vld [vmem:[#allocation5 + $0x10] sm:$0xff]   ;;  %s971_s15 = sshll.u32 %s1430_s13, 6 }
  0x56   : > { %1366 = vsyncadd (%p1688_p1), [#allocation6], 4294961152  ;;  %1028 = vmatprep.subr.bf16.mxu0 %v1391_v0  ;;  %1044 = vmatprep.mubr.msk.bf16.mxu0 %vm1392_vm0, %v1391_v0  ;;  %v1217_v4 = vld [vmem:[#allocation5 + $0x40] sm:$0xff]   ;;  %v1212_v5 = vld [vmem:[#allocation5 + $0x18] sm:$0xff]   ;;  %s173_s17 = scalar_lea.vmem [#allocation7], %s919_s26  ;;  %s1628_s28 = scalar_lea.hbm %s1674_s2, %s971_s15 }
  0x57   : > { %1048 = vmatprep.subr.bf16.mxu1 %v1391_v0  ;;  %1064 = vmatprep.mubr.msk.bf16.mxu1 %vm1392_vm0, %v1391_v0  ;;  %v1218_v6 = vld [vmem:[#allocation5 + $0x48] sm:$0xff]   ;;  %v1213_v7 = vld [vmem:[#allocation5 + $0x20] sm:$0xff]   ;;  %v1219_v8 = vld [vmem:[#allocation5 + $0x50] sm:$0xff]   ;;  %s832_s27 = sshll.u32 %s173_s17, 4  ;;  %s819_s13 = scalar_lea.sflag [#allocation4], %s1545_s20  ;;  %s1630_s27 = int_to_ptr.vmem [resolvable:$true] %s832_s27 }
  0x58   : > { %1029 = vmatpush3.bf16.msra.mxu0 %v1209_v1  ;;  %1049 = vmatpush3.bf16.msra.mxu1 %v1217_v4  ;;  %v1214_v9 = vld [vmem:[#allocation5 + $0x28] sm:$0xff]   ;;  %v1220_v10 = vld [vmem:[#allocation5 + $0x58] sm:$0xff]   ;;  %v1215_v11 = vld [vmem:[#allocation5 + $0x30] sm:$0xff]   ;;  %s1315_s30 = scalar_lea.vmem %s1630_s27, 64  ;;  %s1393_s3 = smov [#allocation7]  }
  0x59   : > { %1030 = vmatprep.subr.bf16.mxu0 %v1391_v0  ;;  %1050 = vmatprep.subr.bf16.mxu1 %v1391_v0  ;;  %v1221_v12 = vld [vmem:[#allocation5 + $0x60] sm:$0xff]   ;;  %v1216_v13 = vld [vmem:[#allocation5 + $0x38] sm:$0xff]   ;;  %v1222_v14 = vld [vmem:[#allocation5 + $0x68] sm:$0xff]   ;;  %p1316_p4 = scmp.ne.s32.totalorder %s1630_s27, %s1315_s30  ;;  %s1319_s4 = sshll.u32 %s1393_s3, 4  ;;  %s1320_s4 = int_to_ptr.vmem [resolvable:$false] %s1319_s4 }
  0x5a   : > { %v175_v15 = vld [vmem:[%s1551_s29] sm:$0xf]  ;;  %v1223_v16 = vld [vmem:[#allocation5 + $0x70] sm:$0xff]   ;;  %v1225_v18 = vld [vmem:[#allocation5 + $0x80] sm:$0xff]   ;;  %s1321_s5 = scalar_lea.vmem %s1320_s4, 128  ;;  %p1322_p10 = scmp.lt.s32.totalorder %s1630_s27, %s1320_s4 }
  0x5b   : > { %v1224_v17 = vld [vmem:[#allocation5 + $0x78] sm:$0xff]   ;;  %v1226_v19 = vld [vmem:[#allocation5 + $0x88] sm:$0xff]   ;;  %v1227_v20 = vld [vmem:[#allocation5 + $0x90] sm:$0xff]   ;;  %p1317_p6 = pnand %p1316_p4, %p1500_p12  ;;  %p1323_p13 = scmp.lt.s32.totalorder %s1321_s5, %s1315_s30 }
  0x5c   : > { %1031 = vmatpush3.bf16.msra.mxu0 %v1210_v2  ;;  %1051 = vmatpush3.bf16.msra.mxu1 %v1218_v6  ;;  %v1228_v21 = vld [vmem:[#allocation5 + $0x98] sm:$0xff]   ;;  %v1229_v22 = vld [vmem:[#allocation5 + $0xa0] sm:$0xff]   ;;  %v1230_v23 = vld [vmem:[#allocation5 + $0xa8] sm:$0xff]  }
  0x5d   : > { %1032 = vmatprep.subr.bf16.mxu0 %v1391_v0  ;;  %1052 = vmatprep.subr.bf16.mxu1 %v1391_v0  ;;  %v1231_v24 = vld [vmem:[#allocation5 + $0xb0] sm:$0xff]   ;;  %v1232_v31 = vld [vmem:[#allocation5 + $0xb8] sm:$0xff]   ;;  %v1233_v32 = vld [vmem:[#allocation5 + $0xc0] sm:$0xff]   ;;  %p1318_p8 = pneg %p1317_p6  ;;  %p1324_p3 = por %p1323_p13, %p1322_p10 }
  0x5e   : > { %v1234_v33 = vld [vmem:[#allocation5 + $0xc8] sm:$0xff]   ;;  %v1235_v34 = vld [vmem:[#allocation5 + $0xd0] sm:$0xff]   ;;  %v1236_v35 = vld [vmem:[#allocation5 + $0xd8] sm:$0xff]  }
  0x5f   : > { %v1237_v36 = vld [vmem:[#allocation5 + $0xe0] sm:$0xff]   ;;  %v1238_v37 = vld [vmem:[#allocation5 + $0xe8] sm:$0xff]   ;;  %v1239_v38 = vld [vmem:[#allocation5 + $0xf0] sm:$0xff]   ;;  %p1325_p7 = pnand %p1324_p3, %p1318_p8 }
  0x60   : > { %1033 = vmatpush3.bf16.msra.mxu0 %v1211_v3  ;;  %1053 = vmatpush3.bf16.msra.mxu1 %v1219_v8  ;;  %v1240_v45 = vld [vmem:[#allocation5 + $0xf8] sm:$0xff]   ;;  %v1241_v46 = vld [vmem:[#allocation5 + $0x100] sm:$0xff]   ;;  %v1242_v47 = vld [vmem:[#allocation5 + $0x108] sm:$0xff]  }
  0x61   : > { %1034 = vmatprep.subr.bf16.mxu0 %v1391_v0  ;;  %1054 = vmatprep.subr.bf16.mxu1 %v1391_v0  ;;  %v1243_v48 = vld [vmem:[#allocation5 + $0x110] sm:$0xff]   ;;  %v1244_v49 = vld [vmem:[#allocation5 + $0x118] sm:$0xff]   ;;  %v1245_v50 = vld [vmem:[#allocation5 + $0x120] sm:$0xff]  }
  0x62   : > { %v1246_v51 = vld [vmem:[#allocation5 + $0x128] sm:$0xff]   ;;  %v1247_v52 = vld [vmem:[#allocation5 + $0x130] sm:$0xff]   ;;  %v1248_v59 = vld [vmem:[#allocation5 + $0x138] sm:$0xff]  }
  0x63   : > { %v1249_v60 = vld [vmem:[#allocation5 + $0x140] sm:$0xff]   ;;  %v1250_v61 = vld [vmem:[#allocation5 + $0x148] sm:$0xff]   ;;  %v1251_v62 = vld [vmem:[#allocation5 + $0x150] sm:$0xff]  }
  0x64   : > { %1035 = vmatpush3.bf16.msra.mxu0 %v1212_v5  ;;  %1055 = vmatpush3.bf16.msra.mxu1 %v1220_v10  ;;  %v1252_v63 = vld [vmem:[#allocation5 + $0x158] sm:$0xff]   ;;  %v1253_v1 = vld [vmem:[#allocation5 + $0x160] sm:$0xff]   ;;  %v1254_v2 = vld [vmem:[#allocation5 + $0x168] sm:$0xff]  }
  0x65   : > { %1036 = vmatprep.subr.bf16.mxu0 %v1391_v0  ;;  %1056 = vmatprep.subr.bf16.mxu1 %v1391_v0  ;;  %v1255_v3 = vld [vmem:[#allocation5 + $0x170] sm:$0xff]   ;;  %v1256_v10 = vld [vmem:[#allocation5 + $0x178] sm:$0xff]  }
  0x68   : > { %1037 = vmatpush3.bf16.msra.mxu0 %v1213_v7  ;;  %1057 = vmatpush3.bf16.msra.mxu1 %v1221_v12 }
  0x69   : > { %1038 = vmatprep.subr.bf16.mxu0 %v1391_v0  ;;  %1058 = vmatprep.subr.bf16.mxu1 %v1391_v0 }
  0x6c   : > { %1039 = vmatpush3.bf16.msra.mxu0 %v1214_v9  ;;  %1059 = vmatpush3.bf16.msra.mxu1 %v1222_v14 }
  0x6d   : > { %1040 = vmatprep.subr.bf16.mxu0 %v1391_v0  ;;  %1060 = vmatprep.subr.bf16.mxu1 %v1391_v0 }
  0x70   : > { %1041 = vmatpush3.bf16.msra.mxu0 %v1215_v11  ;;  %1061 = vmatpush3.bf16.msra.mxu1 %v1223_v16 }
  0x71   : > { %1042 = vmatprep.subr.bf16.mxu0 %v1391_v0  ;;  %1062 = vmatprep.subr.bf16.mxu1 %v1391_v0 }
  0x74   : > { %1043 = vmatpush3.bf16.msra.mxu0 %v1216_v13  ;;  %1063 = vmatpush3.bf16.msra.mxu1 %v1224_v17 }
  0x75   : > { %1068 = vmatprep.subr.bf16.mxu0 %v1391_v0  ;;  %1088 = vmatprep.subr.bf16.mxu1 %v1391_v0 }
  0x77   : > { %1045 = vmatmul.mubr.bf16.vlgmr.msra.gmra.mrb[0].mxu0 %v175_v15 }
  0x78   : > { %1084 = vmatprep.mubr.msk.bf16.mxu0 %vm1392_vm0, %v1391_v0  ;;  %1069 = vmatpush3.bf16.msra.mxu0 %v1225_v18 }
  0x79   : > { %1070 = vmatprep.subr.bf16.mxu0 %v1391_v0 }
  0x7c   : > { %1071 = vmatpush3.bf16.msra.mxu0 %v1226_v19 }
  0x7d   : > { %1072 = vmatprep.subr.bf16.mxu0 %v1391_v0 }
  0x80   : > { %1073 = vmatpush3.bf16.msra.mxu0 %v1227_v20 }
  0x81   : > { %1074 = vmatprep.subr.bf16.mxu0 %v1391_v0 }
  0x84   : > { %1075 = vmatpush3.bf16.msra.mxu0 %v1228_v21 }
  0x85   : > { %1076 = vmatprep.subr.bf16.mxu0 %v1391_v0 }
  0x88   : > { %1077 = vmatpush3.bf16.msra.mxu0 %v1229_v22 }
  0x89   : > { %1078 = vmatprep.subr.bf16.mxu0 %v1391_v0 }
  0x8c   : > { %1079 = vmatpush3.bf16.msra.mxu0 %v1230_v23 }
  0x8d   : > { %1080 = vmatprep.subr.bf16.mxu0 %v1391_v0 }
  0x90   : > { %1081 = vmatpush3.bf16.msra.mxu0 %v1231_v24 }
  0x91   : > { %1082 = vmatprep.subr.bf16.mxu0 %v1391_v0 }
  0x94   : > { %1083 = vmatpush3.bf16.msra.mxu0 %v1232_v31 }
  0x95   : > { %1108 = vmatprep.subr.bf16.mxu0 %v1391_v0 }
 0x14a   : > { %v274_v25 = vpop.f32.mrb[0].mxu0 }
 0x14b   : > { %v280_v26 = vmax.f32 %v274_v25, 0.0  ;;  %v1046_v27 = vpop.f32.mrb[1].mxu0 }
 0x14c   : > { %v277_v28 = vpop.f32.mrb[2].mxu0 }
 0x14d   : > { %v281_v29 = vpack.c.bf16 %v280_v26, %v280_v26  ;;  %v1047_v30 = vpop.f32.mrb[3].mxu0 }
 0x14f   : > { %1065 = vmatmul.mubr.bf16.vlgmr.msra.gmra.mrb[0].mxu1 %v281_v29 }
 0x150   : > { %1104 = vmatprep.mubr.msk.bf16.mxu1 %vm1392_vm0, %v1391_v0  ;;  %1089 = vmatpush3.bf16.msra.mxu1 %v1233_v32 }
 0x151   : > { %1090 = vmatprep.subr.bf16.mxu1 %v1391_v0 }
 0x154   : > { %1091 = vmatpush3.bf16.msra.mxu1 %v1234_v33 }
 0x155   : > { %1092 = vmatprep.subr.bf16.mxu1 %v1391_v0 }
 0x158   : > { %1093 = vmatpush3.bf16.msra.mxu1 %v1235_v34 }
 0x159   : > { %1094 = vmatprep.subr.bf16.mxu1 %v1391_v0 }
 0x15c   : > { %1095 = vmatpush3.bf16.msra.mxu1 %v1236_v35 }
 0x15d   : > { %1096 = vmatprep.subr.bf16.mxu1 %v1391_v0 }
 0x160   : > { %1097 = vmatpush3.bf16.msra.mxu1 %v1237_v36 }
 0x161   : > { %1098 = vmatprep.subr.bf16.mxu1 %v1391_v0 }
 0x164   : > { %1099 = vmatpush3.bf16.msra.mxu1 %v1238_v37 }
 0x165   : > { %1100 = vmatprep.subr.bf16.mxu1 %v1391_v0 }
 0x168   : > { %1101 = vmatpush3.bf16.msra.mxu1 %v1239_v38 }
 0x169   : > { %1102 = vmatprep.subr.bf16.mxu1 %v1391_v0 }
 0x16c   : > { %1103 = vmatpush3.bf16.msra.mxu1 %v1240_v45 }
 0x16d   : > { %1128 = vmatprep.subr.bf16.mxu1 %v1391_v0 }
 0x222   : > { %v381_v39 = vpop.f32.mrb[0].mxu1 }
 0x223   : > { %v387_v40 = vmax.f32 %v381_v39, 0.0  ;;  %v1066_v41 = vpop.f32.mrb[1].mxu1 }
 0x224   : > { %v384_v42 = vpop.f32.mrb[2].mxu1 }
 0x225   : > { %v388_v43 = vpack.c.bf16 %v387_v40, %v387_v40  ;;  %v1067_v44 = vpop.f32.mrb[3].mxu1 }
 0x227   : > { %1085 = vmatmul.mubr.bf16.vlgmr.msra.gmra.mrb[4].mxu0 %v388_v43 }
 0x228   : > { %1124 = vmatprep.mubr.msk.bf16.mxu0 %vm1392_vm0, %v1391_v0  ;;  %1109 = vmatpush3.bf16.msra.mxu0 %v1241_v46 }
 0x229   : > { %1110 = vmatprep.subr.bf16.mxu0 %v1391_v0 }
 0x22c   : > { %1111 = vmatpush3.bf16.msra.mxu0 %v1242_v47 }
 0x22d   : > { %1112 = vmatprep.subr.bf16.mxu0 %v1391_v0 }
 0x230   : > { %1113 = vmatpush3.bf16.msra.mxu0 %v1243_v48 }
 0x231   : > { %1114 = vmatprep.subr.bf16.mxu0 %v1391_v0 }
 0x234   : > { %1115 = vmatpush3.bf16.msra.mxu0 %v1244_v49 }
 0x235   : > { %1116 = vmatprep.subr.bf16.mxu0 %v1391_v0 }
 0x238   : > { %1117 = vmatpush3.bf16.msra.mxu0 %v1245_v50 }
 0x239   : > { %1118 = vmatprep.subr.bf16.mxu0 %v1391_v0 }
 0x23c   : > { %1119 = vmatpush3.bf16.msra.mxu0 %v1246_v51 }
 0x23d   : > { %1120 = vmatprep.subr.bf16.mxu0 %v1391_v0 }
 0x240   : > { %1121 = vmatpush3.bf16.msra.mxu0 %v1247_v52 }
 0x241   : > { %1122 = vmatprep.subr.bf16.mxu0 %v1391_v0 }
 0x244   : > { %1123 = vmatpush3.bf16.msra.mxu0 %v1248_v59 }
 0x2fa   : > { %v488_v53 = vpop.f32.mrb[4].mxu0 }
 0x2fb   : > { %v494_v54 = vmax.f32 %v488_v53, 0.0  ;;  %v1086_v55 = vpop.f32.mrb[5].mxu0 }
 0x2fc   : > { %v491_v56 = vpop.f32.mrb[6].mxu0 }
 0x2fd   : > { %v495_v57 = vpack.c.bf16 %v494_v54, %v494_v54  ;;  %v1087_v58 = vpop.f32.mrb[7].mxu0 }
 0x2ff   : > { %1105 = vmatmul.mubr.bf16.vlgmr.msra.gmra.mrb[4].mxu1 %v495_v57 }
 0x300   : > { %1144 = vmatprep.mubr.msk.bf16.mxu1 %vm1392_vm0, %v1391_v0  ;;  %1129 = vmatpush3.bf16.msra.mxu1 %v1249_v60 }
 0x301   : > { %1130 = vmatprep.subr.bf16.mxu1 %v1391_v0 }
 0x304   : > { %1131 = vmatpush3.bf16.msra.mxu1 %v1250_v61 }
 0x305   : > { %1132 = vmatprep.subr.bf16.mxu1 %v1391_v0 }
 0x308   : > { %1133 = vmatpush3.bf16.msra.mxu1 %v1251_v62 }
 0x309   : > { %1134 = vmatprep.subr.bf16.mxu1 %v1391_v0 }
 0x30c   : > { %1135 = vmatpush3.bf16.msra.mxu1 %v1252_v63 }
 0x30d   : > { %1136 = vmatprep.subr.bf16.mxu1 %v1391_v0 }
 0x310   : > { %1137 = vmatpush3.bf16.msra.mxu1 %v1253_v1 }
 0x311   : > { %1138 = vmatprep.subr.bf16.mxu1 %v1391_v0 }
 0x314   : > { %1139 = vmatpush3.bf16.msra.mxu1 %v1254_v2 }
 0x315   : > { %1140 = vmatprep.subr.bf16.mxu1 %v1391_v0 }
 0x318   : > { %1141 = vmatpush3.bf16.msra.mxu1 %v1255_v3 }
 0x319   : > { %1142 = vmatprep.subr.bf16.mxu1 %v1391_v0 }
 0x31c   : > { %1143 = vmatpush3.bf16.msra.mxu1 %v1256_v10 }
 0x3d2   : > { %v595_v4 = vpop.f32.mrb[4].mxu1 }
 0x3d3   : > { %v601_v5 = vmax.f32 %v595_v4, 0.0  ;;  %v1106_v6 = vpop.f32.mrb[5].mxu1 }
 0x3d4   : > { %v598_v7 = vpop.f32.mrb[6].mxu1 }
 0x3d5   : > { %v602_v8 = vpack.c.bf16 %v601_v5, %v601_v5  ;;  %v1107_v9 = vpop.f32.mrb[7].mxu1 }
 0x3d7   : > { %1125 = vmatmul.mubr.bf16.vlgmr.msra.gmra.mrb[8].mxu0 %v602_v8 }
 0x4aa   : > { %v702_v11 = vpop.f32.mrb[8].mxu0 }
 0x4ab   : > { %v708_v12 = vmax.f32 %v702_v11, 0.0  ;;  %v1126_v13 = vpop.f32.mrb[9].mxu0 }
 0x4ac   : > { %v705_v14 = vpop.f32.mrb[10].mxu0 }
 0x4ad   : > { %v709_v15 = vpack.c.bf16 %v708_v12, %v708_v12  ;;  %v1127_v16 = vpop.f32.mrb[11].mxu0 }
 0x4af   : > { %1145 = vmatmul.mubr.bf16.vlgmr.msra.gmra.mrb[8].mxu1 %v709_v15 }
 0x582   : > { %v809_v0 = vpop.f32.mrb[8].mxu1 }
 0x583   : > { %v815_v17 = vmax.f32 %v809_v0, 0.0  ;;  %v1146_v18 = vpop.f32.mrb[9].mxu1 }
 0x584   : > { %v812_v19 = vpop.f32.mrb[10].mxu1 }
 0x585   : > { %v816_v20 = vpack.c.bf16 %v815_v17, %v815_v17  ;;  %v1147_v21 = vpop.f32.mrb[11].mxu1 }
 0x587   : > { %817 = vst [vmem:[%s173_s17] sm:$0xf] %v816_v20 }
 0x588   : > { %1328 = shalt.err (!%p1325_p7)
}
 0x589   : > { %s1329_s6 = scalar_lea.hbm %s1628_s28, 64  ;;  %s1333_s24 = scalar_lea.hbm %s1674_s2, 128 }
 0x58a   : > { %p1330_p9 = scmp.ne.s32.totalorder %s1628_s28, %s1329_s6  ;;  %p1334_p0 = scmp.lt.u32.totalorder %s1628_s28, %s1674_s2 }
 0x58b   : > { %p1335_p11 = scmp.lt.u32.totalorder %s1333_s24, %s1329_s6  ;;  %p1337_p4 = scmp.lt.u32.totalorder %s1329_s6, %s1628_s28 }
 0x58c   : > { %p1331_p2 = pnand %p1330_p9, %p1500_p12 }
 0x58d   : > { %p1336_p1 = por %p1335_p11, %p1334_p0 }
 0x58e   : > { %p1332_p5 = pneg %p1331_p2 }
 0x58f   : > { %p1338_p6 = por %p1337_p4, %p1336_p1 }
 0x591   : > { %p1339_p8 = pnand %p1338_p6, %p1332_p5 }
 0x593   : > { %1342 = shalt.err (!%p1339_p8)
}
 0x594   : > { %1154 = dma.vmem_to_hbm [thread:$0]  (%p1500_p12), %s1630_s27, 64, %s1628_s28, %s819_s13  }
 0x595 PF: > { %s844_s26 = sand.u32 1, %s1373_s9   ;;  %p1689_p10 = scmp.ne.s32.totalorder %s1679_s16, 0 }
 0x596   : > { %p1690_p13 = scmp.ge.s32.totalorder %s1385_s12, 2  ;;  %s845_s19 = scalar_lea.sflag [#allocation4], %s844_s26 }
 0x598   : > { %p1165_p3 = pnand %p1690_p13, %p1689_p10 }
 0x59a   : > { %1368 = dma.done.wait (!%p1165_p3), %s845_s19, 64  }
 0x59b   : > { %1370 = vsyncadd (!%p1165_p3), %s845_s19, 4294967232  ;;  %p16_p7 = scmp.ge.s32.totalorder %s1465_s21, 4   ;;  %s1691_s9 = smov %s1377_s10 }
 0x59c   : > { %s1692_s10 = smov %s1381_s11  ;;  %s1693_s11 = smov %s1496_s8 }
 0x59d   : > { %s1694_s12 = smov %s1465_s21  ;;  %18 = sbr.rel (!%p16_p7) target bundleno = 6 (0x6), region = 82 }
 0x5a4   :  { %850 = vsyncpa [#allocation3], 1 }
 0x5a5   :  { %852 = vsyncpa [#allocation3 + $0x1], 1 }
 0x5a6   :  { %853 = vsyncpa [#allocation6], 1 }
 0x5a7   :  { %854 = vsyncpa [#allocation4], 1 }
 0x5a8   :  { %856 = vsyncpa [#allocation4 + $0x1], 1 }

</bundles_post_ra>
